<compile_context>
chip_gen: v5e
topology: v5e:2x2
jax: 0.10.0
libtpu: 0.0.40
codegen_flags: <defaults>
</compile_context>

<pallas_src>
import math
from functools import partial

import jax
import jax.numpy as jnp
from jax import lax
from jax.experimental import pallas as pl
from jax.experimental.pallas import tpu as pltpu


VMEM_LIMIT = 64 * 1024 * 1024       # scoped-VMEM request; fits v7x's 64 MiB physical
_TILE_BUDGET = 24 * 1024 * 1024     # per-step budget for double-buffered blocks


# ---------------------------------------------------------------------------
# helpers
# ---------------------------------------------------------------------------
def _row_tile(m, row_cols, *, cap=1024, itemsize=4, budget=_TILE_BUDGET):
    """Largest row tile <= cap that divides m, is a multiple of 8 and keeps the
    double-buffered row-tiled blocks (row_cols total columns) under budget."""
    if m % 8 != 0:
        # TODO(synk): pad odd token counts instead of one whole-array block.
        return m
    limit = budget // max(1, 2 * row_cols * itemsize)
    t = min(cap, m, max(8, limit))
    t -= t % 8
    t = max(t, 8)
    while m % t:
        t -= 8
    return t


def _conv_row_tile(H, W, F, *, itemsize=4, budget=_TILE_BUDGET):
    """Largest row tile dividing H whose in/out blocks + pad scratch fit budget."""
    best = 1
    for th in range(1, H + 1):
        if H % th:
            continue
        need = (4 * th * W * F * itemsize            # in + out, double-buffered
                + (th + 2) * (W + 2) * F * 4         # f32 pad scratch
                + 8 * W * F * itemsize)              # halo rows, double-buffered
        if need <= budget:
            best = th
    return best


def _rows_spec(tm, ncols):
    # row-tiled (tm, ncols) block for a rank-1 grid
    return pl.BlockSpec((tm, ncols), lambda i: (i, 0))


def _rep_spec(shape):
    # same (whole) block for every grid step (weights / biases)
    # TODO(synk): pipeline_mode=pl.Buffered(1) would halve their VMEM footprint.
    return pl.BlockSpec(shape, lambda i: (0,) * len(shape))


def _params(dims):
    return pltpu.CompilerParams(dimension_semantics=dims,
                                vmem_limit_bytes=VMEM_LIMIT)


def _ce(flops, bytes_accessed, transcendentals=0):
    return pl.CostEstimate(flops=int(flops),
                           transcendentals=int(transcendentals),
                           bytes_accessed=int(bytes_accessed))


def _ln(x, g, b, eps):
    mu = jnp.mean(x, axis=-1, keepdims=True)
    xc = x - mu
    var = jnp.mean(xc * xc, axis=-1, keepdims=True)
    return xc * lax.rsqrt(var + eps) * g + b


# ---------------------------------------------------------------------------
# kernel bodies
# ---------------------------------------------------------------------------
def _ln_q_kernel(x_ref, g_ref, b_ref, qw_ref, qb_ref, xn_ref, q_ref, *, eps):
    # fused: xn = LN(x);  q = xn @ qw + qb   (attention scale pre-folded)
    xn = _ln(x_ref[...].astype(jnp.float32), g_ref[...], b_ref[...], eps)
    xn_c = xn.astype(xn_ref.dtype)
    xn_ref[...] = xn_c
    q = jnp.dot(xn_c, qw_ref[...], preferred_element_type=jnp.float32) + qb_ref[...]
    q_ref[...] = q.astype(q_ref.dtype)


def _sr_ln_kernel(x_ref, w_ref, b_ref, g_ref, gb_ref, o_ref, *, eps):
    # sr strided conv (kernel=stride=sr) as a patch matmul + LayerNorm.
    # x_ref: (1, sr, ww, sr*C) — rows i*sr .. i*sr+sr-1 of xn viewed as
    # (B, h, ww, sr*C) (free host reshape, no transpose).
    # w_ref: (sr, sr*C, C) — torch conv weight re-laid out as (ki, kj*C+ci, out).
    x = x_ref[0]                                  # (sr, ww, sr*C)
    sr = x.shape[0]
    ww = x.shape[1]
    cout = w_ref.shape[-1]
    acc = jnp.zeros((ww, cout), jnp.float32) + b_ref[...].astype(jnp.float32)
    for ki in range(sr):
        acc = acc + jnp.dot(x[ki], w_ref[ki], preferred_element_type=jnp.float32)
    o_ref[0] = _ln(acc, g_ref[...], gb_ref[...], eps).astype(o_ref.dtype)


def _attn_kernel(q_ref, kvin_ref, kvw_ref, kvb_ref, pw_ref, pb_ref, r_ref,
                 o_ref, k_sc, v_sc, *, num_heads):
    # fused: K/V projection (once per batch) + multi-head attention + output
    # projection + residual add.  All stores stay lane-dense (tq, C).
    # TODO(synk): for very long sequences with sr_ratio=1, switch to a
    # kv-tiled online-softmax (flash) grid.
    t = pl.program_id(1)
    C = q_ref.shape[-1]
    ch = C // num_heads

    @pl.when(t == 0)
    def _():
        kv = (jnp.dot(kvin_ref[0], kvw_ref[...],
                      preferred_element_type=jnp.float32) + kvb_ref[...])
        k_sc[...] = kv[:, :C]
        v_sc[...] = kv[:, C:]

    q = q_ref[0].astype(jnp.float32)              # (tq, C); scale folded into q
    tq = q.shape[0]
    acc = jnp.zeros((tq, C), jnp.float32) + pb_ref[...].astype(jnp.float32)
    for m in range(num_heads):
        sl = slice(m * ch, (m + 1) * ch)
        s = lax.dot_general(q[:, sl], k_sc[:, sl], (((1,), (1,)), ((), ())),
                            preferred_element_type=jnp.float32)       # (tq, Nk)
        s = s - jnp.max(s, axis=-1, keepdims=True)
        p = jnp.exp(s)
        # approx EUP reciprocal: ~1e-3 relative deviation, fine for inference.
        p = p * pl.reciprocal(jnp.sum(p, axis=-1, keepdims=True), approx=True)
        ph = jnp.dot(p, v_sc[:, sl], preferred_element_type=jnp.float32)
        # fold this head's slice of the output projection so the accumulator
        # stays full-width (lane-dense) — no masked per-head vst.
        acc = acc + jnp.dot(ph, pw_ref[sl, :].astype(jnp.float32),
                            preferred_element_type=jnp.float32)
    o_ref[0] = (r_ref[0].astype(jnp.float32) + acc).astype(o_ref.dtype)


def _ln_matmul_kernel(x_ref, g_ref, gb_ref, w_ref, b_ref, o_ref, *, eps):
    # fused: o = LN(x) @ w + b     (LayerNorm2 + fc1)
    xn = _ln(x_ref[...].astype(jnp.float32), g_ref[...], gb_ref[...], eps)
    y = jnp.dot(xn.astype(w_ref.dtype), w_ref[...],
                preferred_element_type=jnp.float32) + b_ref[...]
    o_ref[...] = y.astype(o_ref.dtype)


def _matmul_res_kernel(x_ref, w_ref, b_ref, r_ref, o_ref):
    # fused: o = residual + x @ w + b    (fc2 + residual)
    y = jnp.dot(x_ref[...], w_ref[...],
                preferred_element_type=jnp.float32) + b_ref[...]
    o_ref[...] = (r_ref[...].astype(jnp.float32) + y).astype(o_ref.dtype)


def _erf(x):
    # Abramowitz & Stegun 7.1.26 polynomial erf (|abs err| < 1.5e-7); matches
    # torch's exact-GELU semantics at f32 precision.
    a1, a2, a3, a4, a5 = (0.254829592, -0.284496736, 1.421413741,
                          -1.453152027, 1.061405429)
    p = 0.3275911
    s = jnp.sign(x)
    ax = jnp.abs(x)
    # TODO(synk): pl.reciprocal(..., approx=True) moves this divide to the EUP
    # slot at ~1e-3 relative error; kept exact for parity with torch.
    t = 1.0 / (1.0 + p * ax)
    poly = ((((a5 * t + a4) * t + a3) * t + a2) * t + a1) * t
    return s * (1.0 - poly * jnp.exp(-ax * ax))


def _dwconv_gelu_kernel(x_ref, xt_ref, xb_ref, w_ref, b_ref, o_ref, pad_ref):
    # depthwise 3x3 conv (padding=1, groups=F) fused with exact GELU.
    # Row-tiled with 1-row halos; the zero border lives only in VMEM scratch.
    i = pl.program_id(1)
    nrow = pl.num_programs(1)
    _, th, W, F_ = x_ref.shape

    # zero only the 1-pixel left/right border strips (interior is overwritten)
    zcol = jnp.zeros((th + 2, 1, F_), jnp.float32)
    pad_ref[:, 0:1, :] = zcol
    pad_ref[:, W + 1:W + 2, :] = zcol
    # interior rows
    pad_ref[1:th + 1, 1:W + 1, :] = x_ref[0].astype(jnp.float32)
    # 1-row halos (clamped fetch; zeroed at the true image border)
    top = xt_ref[0].astype(jnp.float32) * (i > 0).astype(jnp.float32)
    bot = xb_ref[0].astype(jnp.float32) * (i < nrow - 1).astype(jnp.float32)
    pad_ref[0:1, 1:W + 1, :] = top
    pad_ref[th + 1:th + 2, 1:W + 1, :] = bot

    acc = jnp.zeros((th, W, F_), jnp.float32) + b_ref[...].astype(jnp.float32)
    for dx in range(3):                           # 3 W-shifted slabs, hoisted
        slab = pad_ref[:, dx:dx + W, :]           # (th+2, W, F)
        for dy in range(3):                       # dy only strides the outer dim
            tap = w_ref[dy * 3 + dx: dy * 3 + dx + 1, :]       # (1, F)
            acc = acc + slab[dy:dy + th] * tap
    y = 0.5 * acc * (1.0 + _erf(acc * (1.0 / math.sqrt(2.0))))
    o_ref[0] = y.astype(o_ref.dtype)


# ---------------------------------------------------------------------------
# pallas_call wrappers
# ---------------------------------------------------------------------------
# TODO(synk): add K-axis tiling with a VMEM f32 accumulator to the fused
# matmuls if channel widths grow beyond a few thousand; at SegFormer widths
# the whole (K, N) weight tile fits VMEM so full-K blocks are used.
def ln_q(x2d, g, b, qw, qb, eps):
    M, C = x2d.shape
    tm = _row_tile(M, 3 * C)
    return pl.pallas_call(
        partial(_ln_q_kernel, eps=eps),
        grid=(M // tm,),
        in_specs=[_rows_spec(tm, C), _rep_spec((1, C)), _rep_spec((1, C)),
                  _rep_spec((C, C)), _rep_spec((1, C))],
        out_specs=(_rows_spec(tm, C), _rows_spec(tm, C)),
        out_shape=(jax.ShapeDtypeStruct((M, C), x2d.dtype),
                   jax.ShapeDtypeStruct((M, C), x2d.dtype)),
        compiler_params=_params(("parallel",)),
        cost_estimate=_ce(2 * M * C * C + 8 * M * C,
                          (3 * M * C + C * C) * 4, transcendentals=M),
    )(x2d, g, b, qw, qb)


def sr_conv_ln(xn4, w, b, g, gb, eps):
    # xn4: (B, h, ww, sr*C) — free host reshape of xn, no transpose
    B, h, ww, srC = xn4.shape
    sr = w.shape[0]
    C = w.shape[-1]
    hh = h // sr
    return pl.pallas_call(
        partial(_sr_ln_kernel, eps=eps),
        grid=(B, hh),
        in_specs=[
            pl.BlockSpec((1, sr, ww, srC), lambda bb, i: (bb, i, 0, 0)),
            pl.BlockSpec((sr, srC, C), lambda bb, i: (0, 0, 0)),
            pl.BlockSpec((1, C), lambda bb, i: (0, 0)),
            pl.BlockSpec((1, C), lambda bb, i: (0, 0)),
            pl.BlockSpec((1, C), lambda bb, i: (0, 0)),
        ],
        out_specs=pl.BlockSpec((1, ww, C), lambda bb, i: (bb * hh + i, 0, 0)),
        out_shape=jax.ShapeDtypeStruct((B * hh, ww, C), xn4.dtype),
        compiler_params=_params(("parallel", "parallel")),
        cost_estimate=_ce(2 * B * h * ww * srC * C,
                          (B * h * ww * srC + B * hh * ww * C + sr * srC * C) * 4),
    )(xn4, w, b, g, gb)


def attention_kv_proj_res(q, kv_in, kvw, kvb, pw, pb, res, *, num_heads):
    B, N, C = q.shape
    Nk = kv_in.shape[1]
    tq = _row_tile(N, 3 * C, cap=256)
    return pl.pallas_call(
        partial(_attn_kernel, num_heads=num_heads),
        grid=(B, N // tq),
        in_specs=[
            pl.BlockSpec((1, tq, C), lambda b, t: (b, t, 0)),
            pl.BlockSpec((1, Nk, C), lambda b, t: (b, 0, 0)),
            pl.BlockSpec((C, 2 * C), lambda b, t: (0, 0)),
            pl.BlockSpec((1, 2 * C), lambda b, t: (0, 0)),
            pl.BlockSpec((C, C), lambda b, t: (0, 0)),
            pl.BlockSpec((1, C), lambda b, t: (0, 0)),
            pl.BlockSpec((1, tq, C), lambda b, t: (b, t, 0)),
        ],
        out_specs=pl.BlockSpec((1, tq, C), lambda b, t: (b, t, 0)),
        out_shape=jax.ShapeDtypeStruct((B, N, C), q.dtype),
        scratch_shapes=[pltpu.VMEM((Nk, C), jnp.float32),
                        pltpu.VMEM((Nk, C), jnp.float32)],
        compiler_params=_params(("parallel", "arbitrary")),
        cost_estimate=_ce(B * (4 * Nk * C * C + 4 * N * Nk * C + 2 * N * C * C),
                          (3 * B * N * C + B * Nk * C + 3 * C * C) * 4,
                          transcendentals=B * N * Nk),
    )(q, kv_in, kvw, kvb, pw, pb, res)


def ln_matmul(x2d, g, gb, w, b, eps):
    M, K = x2d.shape
    N = w.shape[1]
    tm = _row_tile(M, K + N)
    return pl.pallas_call(
        partial(_ln_matmul_kernel, eps=eps),
        grid=(M // tm,),
        in_specs=[_rows_spec(tm, K), _rep_spec((1, K)), _rep_spec((1, K)),
                  _rep_spec((K, N)), _rep_spec((1, N))],
        out_specs=_rows_spec(tm, N),
        out_shape=jax.ShapeDtypeStruct((M, N), x2d.dtype),
        compiler_params=_params(("parallel",)),
        cost_estimate=_ce(2 * M * K * N + 8 * M * K,
                          (M * K + M * N + K * N) * 4, transcendentals=M),
    )(x2d, g, gb, w, b)


def matmul_res(x2d, w, b, res2d):
    M, K = x2d.shape
    N = w.shape[1]
    tm = _row_tile(M, K + 2 * N)
    return pl.pallas_call(
        _matmul_res_kernel,
        grid=(M // tm,),
        in_specs=[_rows_spec(tm, K), _rep_spec((K, N)), _rep_spec((1, N)),
                  _rows_spec(tm, N)],
        out_specs=_rows_spec(tm, N),
        out_shape=jax.ShapeDtypeStruct((M, N), x2d.dtype),
        compiler_params=_params(("parallel",)),
        cost_estimate=_ce(2 * M * K * N,
                          (M * K + 2 * M * N + K * N) * 4),
    )(x2d, w, b, res2d)


def dwconv3x3_gelu(x_nhwc, w9f, b1f):
    B, H, W, F_ = x_nhwc.shape
    th = _conv_row_tile(H, W, F_, itemsize=x_nhwc.dtype.itemsize)
    return pl.pallas_call(
        _dwconv_gelu_kernel,
        grid=(B, H // th),
        in_specs=[
            pl.BlockSpec((1, th, W, F_), lambda b, i: (b, i, 0, 0)),
            # 1-row halos: clamped element-row indices (block size 1 along H)
            pl.BlockSpec((1, 1, W, F_),
                         lambda b, i: (b, jnp.maximum(i * th - 1, 0), 0, 0)),
            pl.BlockSpec((1, 1, W, F_),
                         lambda b, i: (b, jnp.minimum(i * th + th, H - 1), 0, 0)),
            pl.BlockSpec((9, F_), lambda b, i: (0, 0)),
            pl.BlockSpec((1, F_), lambda b, i: (0, 0)),
        ],
        out_specs=pl.BlockSpec((1, th, W, F_), lambda b, i: (b, i, 0, 0)),
        out_shape=jax.ShapeDtypeStruct((B, H, W, F_), x_nhwc.dtype),
        scratch_shapes=[pltpu.VMEM((th + 2, W + 2, F_), jnp.float32)],
        compiler_params=_params(("parallel", "parallel")),
        cost_estimate=_ce(28 * B * H * W * F_,
                          2 * B * H * W * F_ * x_nhwc.dtype.itemsize,
                          transcendentals=B * H * W * F_),
    )(x_nhwc, x_nhwc, x_nhwc, w9f, b1f)


# ---------------------------------------------------------------------------
# Parameters (deterministic synthetic init — not a checkpoint)
# ---------------------------------------------------------------------------
def init_params(key, dim, num_heads, sr_ratio, hidden):
    ks = jax.random.split(key, 16)

    def w(k, shape, scale=0.05):
        return (scale * jax.random.normal(k, shape)).astype(jnp.float32)

    p = {}
    p["ln1_g"] = jnp.ones((1, dim), jnp.float32)
    p["ln1_b"] = jnp.zeros((1, dim), jnp.float32)
    p["ln2_g"] = jnp.ones((1, dim), jnp.float32)
    p["ln2_b"] = jnp.zeros((1, dim), jnp.float32)

    # efficient_self_attention
    p["q_w"] = w(ks[0], (dim, dim))
    p["q_b"] = w(ks[1], (1, dim))
    # torch kv rearrange '(a m c)' has a outermost: cols [0,dim)->k, [dim,2dim)->v
    p["kv_w"] = w(ks[2], (dim, 2 * dim))
    p["kv_b"] = w(ks[3], (1, 2 * dim))
    p["proj_w"] = w(ks[4], (dim, dim))
    p["proj_b"] = w(ks[5], (1, dim))
    if sr_ratio > 1:
        # nn.Conv2d(dim, dim, k=sr, stride=sr): weight (out, in, kh, kw)
        sr_w = w(ks[6], (dim, dim, sr_ratio, sr_ratio))
        # re-lay out as (ki, kj*C + ci, out) to match the (sr, ww, sr*C) blocks
        p["sr_w"] = sr_w.transpose(2, 3, 1, 0).reshape(sr_ratio,
                                                       sr_ratio * dim, dim)
        p["sr_b"] = w(ks[7], (1, dim))
        p["srln_g"] = jnp.ones((1, dim), jnp.float32)
        p["srln_b"] = jnp.zeros((1, dim), jnp.float32)

    # mix_feedforward
    p["fc1_w"] = w(ks[8], (dim, hidden))
    p["fc1_b"] = w(ks[9], (1, hidden))
    p["fc2_w"] = w(ks[10], (hidden, dim))
    p["fc2_b"] = w(ks[11], (1, dim))
    # depthwise conv weight in torch: (hidden, 1, 3, 3) -> (9, hidden)
    cw = w(ks[12], (hidden, 1, 3, 3))
    p["conv_w"] = cw[:, 0].transpose(1, 2, 0).reshape(9, hidden)
    p["conv_b"] = w(ks[13], (1, hidden))
    return p


# ---------------------------------------------------------------------------
# transformer_block forward (inference)
# ---------------------------------------------------------------------------
def transformer_block_forward(x, h, w_sp, params, *, num_heads, sr_ratio):
    B, N, C = x.shape
    dt = x.dtype
    ch = C // num_heads
    scale = ch ** (-0.5)

    x2d = x.reshape(B * N, C)

    # fold the attention scale into the q projection:
    # softmax((q*s) @ k^T) == softmax((q @ k^T) * s)
    qw = (params["q_w"] * scale).astype(dt)
    qb = params["q_b"] * scale

    # ---- fused LN1 + q projection (also emits normalized activations) ----
    xn, q2d = ln_q(x2d, params["ln1_g"], params["ln1_b"], qw, qb, 1e-6)

    if sr_ratio > 1:
        sr = sr_ratio
        hh, ww = h // sr, w_sp // sr
        Nk = hh * ww
        # strided conv (kernel=stride=sr) as a patch matmul; the patch gather
        # happens via BlockSpecs over a free reshape (no HBM transpose pass)
        xn4 = xn.reshape(B, h, ww, sr * C)
        kv_in = sr_conv_ln(xn4, params["sr_w"].astype(dt), params["sr_b"],
                           params["srln_g"], params["srln_b"], 1e-5)
        kv_in = kv_in.reshape(B, Nk, C)
    else:
        Nk = N
        kv_in = xn.reshape(B, N, C)

    # ---- fused K/V projection + attention + output projection + residual ----
    x1 = attention_kv_proj_res(q2d.reshape(B, N, C), kv_in,
                               params["kv_w"].astype(dt), params["kv_b"],
                               params["proj_w"].astype(dt), params["proj_b"],
                               x, num_heads=num_heads)          # (B, N, C)

    # ---- fused LN2 + fc1, dwconv + exact GELU, fused fc2 + residual ----
    x1_2d = x1.reshape(B * N, C)
    hidden = params["fc1_w"].shape[1]
    hdn = ln_matmul(x1_2d, params["ln2_g"], params["ln2_b"],
                    params["fc1_w"].astype(dt), params["fc1_b"], 1e-6)
    hdn = dwconv3x3_gelu(hdn.reshape(B, h, w_sp, hidden),
                         params["conv_w"].astype(dt), params["conv_b"])
    out = matmul_res(hdn.reshape(B * N, hidden),
                     params["fc2_w"].astype(dt), params["fc2_b"], x1_2d)
    return out.reshape(B, N, C)


# ---------------------------------------------------------------------------
if __name__ == "__main__":
    B = 2
    dim = 32
    num_heads = 4
    sr_ratio = 2
    h = w_sp = 8
    hidden = dim * 4

    key = jax.random.PRNGKey(0)
    kp, kx = jax.random.split(key)
    params = init_params(kp, dim, num_heads, sr_ratio, hidden)
    x = jax.random.normal(kx, (B, h * w_sp, dim), jnp.float32)

    y = transformer_block_forward(x, h, w_sp, params,
                                  num_heads=num_heads, sr_ratio=sr_ratio)
    y = jax.block_until_ready(y)
    assert y.shape == (B, h * w_sp, dim)
    assert jnp.all(jnp.isfinite(y))
    print("KERNEL_OK")
</pallas_src>

<mosaic_0001>
module attributes {stable_mosaic.version = 11 : i64} {
  func.func @_ln_q_kernel(%arg0: i32, %arg1: memref<128x32xf32, #tpu.memory_space<vmem>>, %arg2: memref<1x32xf32, #tpu.memory_space<vmem>>, %arg3: memref<1x32xf32, #tpu.memory_space<vmem>>, %arg4: memref<32x32xf32, #tpu.memory_space<vmem>>, %arg5: memref<1x32xf32, #tpu.memory_space<vmem>>, %arg6: memref<128x32xf32, #tpu.memory_space<vmem>>, %arg7: memref<128x32xf32, #tpu.memory_space<vmem>>) attributes {dimension_semantics = [#tpu.dimension_semantics<parallel>], iteration_bounds = array<i64: 1>, scalar_prefetch = 0 : i64, scratch_operands = 0 : i64, tpu.core_type = #tpu.core_type<tc>, window_params = [{transform_indices = @transform_0, window_bounds = array<i64: 128, 32>}, {pipeline_mode = #tpu.pipeline_mode<synchronous>, transform_indices = @transform_1, window_bounds = array<i64: 1, 32>}, {pipeline_mode = #tpu.pipeline_mode<synchronous>, transform_indices = @transform_2, window_bounds = array<i64: 1, 32>}, {pipeline_mode = #tpu.pipeline_mode<synchronous>, transform_indices = @transform_3, window_bounds = array<i64: 32, 32>}, {pipeline_mode = #tpu.pipeline_mode<synchronous>, transform_indices = @transform_4, window_bounds = array<i64: 1, 32>}, {transform_indices = @transform_5, window_bounds = array<i64: 128, 32>}, {transform_indices = @transform_6, window_bounds = array<i64: 128, 32>}]} {
    %c0 = arith.constant 0 : index
    %c0_0 = arith.constant 0 : index
    %0 = vector.load %arg1[%c0, %c0_0] : memref<128x32xf32, #tpu.memory_space<vmem>>, vector<128x32xf32>
    %c0_1 = arith.constant 0 : index
    %c0_2 = arith.constant 0 : index
    %1 = vector.load %arg2[%c0_1, %c0_2] : memref<1x32xf32, #tpu.memory_space<vmem>>, vector<1x32xf32>
    %c0_3 = arith.constant 0 : index
    %c0_4 = arith.constant 0 : index
    %2 = vector.load %arg3[%c0_3, %c0_4] : memref<1x32xf32, #tpu.memory_space<vmem>>, vector<1x32xf32>
    %cst = arith.constant dense<0.000000e+00> : vector<128xf32>
    %3 = vector.multi_reduction <add>, %0, %cst [1] : vector<128x32xf32> to vector<128xf32>
    %4 = vector.shape_cast %3 : vector<128xf32> to vector<128x1xf32>
    %cst_5 = arith.constant 3.200000e+01 : f32
    %5 = vector.broadcast %cst_5 : f32 to vector<128x1xf32>
    %6 = arith.divf %4, %5 : vector<128x1xf32>
    %7 = vector.broadcast %6 : vector<128x1xf32> to vector<128x32xf32>
    %8 = arith.subf %0, %7 : vector<128x32xf32>
    %9 = arith.mulf %8, %8 : vector<128x32xf32>
    %cst_6 = arith.constant dense<0.000000e+00> : vector<128xf32>
    %10 = vector.multi_reduction <add>, %9, %cst_6 [1] : vector<128x32xf32> to vector<128xf32>
    %11 = vector.shape_cast %10 : vector<128xf32> to vector<128x1xf32>
    %cst_7 = arith.constant 3.200000e+01 : f32
    %12 = vector.broadcast %cst_7 : f32 to vector<128x1xf32>
    %13 = arith.divf %11, %12 : vector<128x1xf32>
    %cst_8 = arith.constant 9.99999997E-7 : f32
    %14 = vector.broadcast %cst_8 : f32 to vector<128x1xf32>
    %15 = arith.addf %13, %14 : vector<128x1xf32>
    %16 = math.rsqrt %15 : vector<128x1xf32>
    %17 = vector.broadcast %16 : vector<128x1xf32> to vector<128x32xf32>
    %18 = arith.mulf %8, %17 : vector<128x32xf32>
    %19 = vector.broadcast %1 : vector<1x32xf32> to vector<128x32xf32>
    %20 = arith.mulf %18, %19 : vector<128x32xf32>
    %21 = vector.broadcast %2 : vector<1x32xf32> to vector<128x32xf32>
    %22 = arith.addf %20, %21 : vector<128x32xf32>
    %c0_9 = arith.constant 0 : index
    %c0_10 = arith.constant 0 : index
    %23 = vector.load %arg6[%c0_9, %c0_10] : memref<128x32xf32, #tpu.memory_space<vmem>>, vector<128x32xf32>
    tpu.vector_store %arg6[%c0_9, %c0_10], %22 {strides = array<i32>} : memref<128x32xf32, #tpu.memory_space<vmem>>, vector<128x32xf32>,
    %c0_11 = arith.constant 0 : index
    %c0_12 = arith.constant 0 : index
    %24 = vector.load %arg4[%c0_11, %c0_12] : memref<32x32xf32, #tpu.memory_space<vmem>>, vector<32x32xf32>
    %cst_13 = arith.constant dense<0.000000e+00> : vector<128x32xf32>
    %25 = tpu.matmul %22, %24, %cst_13 {dimension_numbers = #tpu.dot_dimension_numbers<[1], [0], [0], [1], [0, 0, 1, 1], [], []>} : vector<128x32xf32>, vector<32x32xf32>, vector<128x32xf32> -> vector<128x32xf32>
    %c0_14 = arith.constant 0 : index
    %c0_15 = arith.constant 0 : index
    %26 = vector.load %arg5[%c0_14, %c0_15] : memref<1x32xf32, #tpu.memory_space<vmem>>, vector<1x32xf32>
    %27 = vector.broadcast %26 : vector<1x32xf32> to vector<128x32xf32>
    %28 = arith.addf %25, %27 : vector<128x32xf32>
    %c0_16 = arith.constant 0 : index
    %c0_17 = arith.constant 0 : index
    %29 = vector.load %arg7[%c0_16, %c0_17] : memref<128x32xf32, #tpu.memory_space<vmem>>, vector<128x32xf32>
    tpu.vector_store %arg7[%c0_16, %c0_17], %28 {strides = array<i32>} : memref<128x32xf32, #tpu.memory_space<vmem>>, vector<128x32xf32>,
    return
  }
  func.func @transform_0(%arg0: i32) -> (i32, i32) {
    %c0_i32 = arith.constant 0 : i32
    %c0_i32_0 = arith.constant 0 : i32
    return %arg0, %c0_i32 : i32, i32
  }
  func.func @transform_1(%arg0: i32) -> (i32, i32) {
    %c0_i32 = arith.constant 0 : i32
    %c0_i32_0 = arith.constant 0 : i32
    %c0_i32_1 = arith.constant 0 : i32
    return %c0_i32, %c0_i32_0 : i32, i32
  }
  func.func @transform_2(%arg0: i32) -> (i32, i32) {
    %c0_i32 = arith.constant 0 : i32
    %c0_i32_0 = arith.constant 0 : i32
    %c0_i32_1 = arith.constant 0 : i32
    return %c0_i32, %c0_i32_0 : i32, i32
  }
  func.func @transform_3(%arg0: i32) -> (i32, i32) {
    %c0_i32 = arith.constant 0 : i32
    %c0_i32_0 = arith.constant 0 : i32
    %c0_i32_1 = arith.constant 0 : i32
    return %c0_i32, %c0_i32_0 : i32, i32
  }
  func.func @transform_4(%arg0: i32) -> (i32, i32) {
    %c0_i32 = arith.constant 0 : i32
    %c0_i32_0 = arith.constant 0 : i32
    %c0_i32_1 = arith.constant 0 : i32
    return %c0_i32, %c0_i32_0 : i32, i32
  }
  func.func @transform_5(%arg0: i32) -> (i32, i32) {
    %c0_i32 = arith.constant 0 : i32
    %c0_i32_0 = arith.constant 0 : i32
    return %arg0, %c0_i32 : i32, i32
  }
  func.func @transform_6(%arg0: i32) -> (i32, i32) {
    %c0_i32 = arith.constant 0 : i32
    %c0_i32_0 = arith.constant 0 : i32
    return %arg0, %c0_i32 : i32, i32
  }
}

</mosaic_0001>

<bundles_post_ra>
// kernel: tpu_custom_call.1
= control target key start
LH: loop header
LB: loop body
LE: loop exit
PB: predicated region body
PF: predicated region fallthrough
CT: control target
= control target key end

     0   :  { %vm40_vm0 = vcmask 261120   ;;  %v665_v32 = vmov 32.0   ;;  %s1486_s0 = inlined_call_operand.vmem [shape: f32[128,32], index: 0, kind: input, shape index: {}]   ;;  %s1487_s1 = inlined_call_operand.vmem [shape: f32[1,32], index: 1, kind: input, shape index: {}]   ;;  %s1488_s2 = inlined_call_operand.vmem [shape: f32[1,32], index: 2, kind: input, shape index: {}]   ;;  %s1489_s4 = inlined_call_operand.vmem [shape: f32[1,32], index: 4, kind: input, shape index: {}]   ;;  %s1490_s3 = inlined_call_operand.vmem [shape: f32[32,32], index: 3, kind: input, shape index: {}]   ;;  %s1491_s5 = inlined_call_operand.vmem [shape: f32[128,32], index: 5, kind: output, shape index: {0}]   ;;  %s1492_s6 = inlined_call_operand.vmem [shape: f32[128,32], index: 6, kind: output, shape index: {1}]  }
   0x1   :  { %v704_v0 = vld [vmem:[%s1486_s0 + $0x48] sm:$0xff]  ;;  %v30_v1 = vld [vmem:[%s1486_s0 + $0x40] sm:$0xff]  ;;  %v740_v12 = vld [vmem:[%s1486_s0 + $0x50] sm:$0xff]  ;;  %631 = vrcp.f32 %v665_v32 }
   0x2   :  { %v22_v2 = vld [vmem:[%s1486_s0] sm:$0xff]  ;;  %v68_v3 = vsel %vm40_vm0, %v704_v0, 0.0  ;;  %v65_v4 = vsel %vm40_vm0, %v30_v1, 0.0  ;;  %v719_v6 = vld [vmem:[%s1486_s0 + $0x68] sm:$0xff]  ;;  %v71_v15 = vsel %vm40_vm0, %v740_v12, 0.0  ;;  %v761_v18 = vld [vmem:[%s1486_s0 + $0x30] sm:$0xff] }
   0x3   :  { %v41_v5 = vsel %vm40_vm0, %v22_v2, 0.0  ;;  %69 = vadd.xlane.f32.xlu2 %v68_v3  ;;  %66 = vadd.xlane.f32.xlu0 %v65_v4  ;;  %v724_v7 = vld [vmem:[%s1486_s0 + $0x60] sm:$0xff]  ;;  %v80_v9 = vsel %vm40_vm0, %v719_v6, 0.0  ;;  %v745_v13 = vld [vmem:[%s1486_s0 + $0x8] sm:$0xff]  ;;  %v766_v19 = vld [vmem:[%s1486_s0 + $0x70] sm:$0xff]  ;;  %v59_v21 = vsel %vm40_vm0, %v761_v18, 0.0 }
   0x4   :  { %42 = vadd.xlane.f32.xlu1 %v41_v5  ;;  %v729_v8 = vld [vmem:[%s1486_s0 + $0x20] sm:$0xff]  ;;  %v77_v10 = vsel %vm40_vm0, %v724_v7, 0.0  ;;  %v750_v14 = vld [vmem:[%s1486_s0 + $0x28] sm:$0xff]  ;;  %v44_v16 = vsel %vm40_vm0, %v745_v13, 0.0  ;;  %v771_v20 = vld [vmem:[%s1486_s0 + $0x10] sm:$0xff]  ;;  %v83_v22 = vsel %vm40_vm0, %v766_v19, 0.0 }
   0x5   :  { %v53_v11 = vsel %vm40_vm0, %v729_v8, 0.0  ;;  %v56_v17 = vsel %vm40_vm0, %v750_v14, 0.0  ;;  %v47_v23 = vsel %vm40_vm0, %v771_v20, 0.0  ;;  %v782_v24 = vld [vmem:[%s1486_s0 + $0x18] sm:$0xff] }
   0x6   :  { %v787_v25 = vld [vmem:[%s1486_s0 + $0x58] sm:$0xff]  ;;  %v50_v27 = vsel %vm40_vm0, %v782_v24, 0.0 }
   0x7   :  { %v792_v26 = vld [vmem:[%s1486_s0 + $0x78] sm:$0xff]  ;;  %v74_v28 = vsel %vm40_vm0, %v787_v25, 0.0  ;;  %v632_v33 = vpop.eup %631 }
   0x8   :  { %v86_v29 = vsel %vm40_vm0, %v792_v26, 0.0  ;;  %v803_v30 = vld [vmem:[%s1486_s0 + $0x38] sm:$0xff]  ;;  %v90_v34 = vmul.f32 32.0, %v632_v33  ;;  %vm94_vm1 = vweird.f32 %v632_v33 }
   0x9   :  { %v62_v31 = vsel %vm40_vm0, %v803_v30, 0.0 }
   0xa   :  { %v91_v35 = vsub.f32 1.0, %v90_v34 }
   0xb   :  { %81 = vadd.xlane.f32.xlu2 %v80_v9  ;;  %78 = vadd.xlane.f32.xlu0 %v77_v10 }
   0xc   :  { %54 = vadd.xlane.f32.xlu1 %v53_v11  ;;  %v92_v36 = vmul.f32 %v632_v33, %v91_v35 }
   0xe   :  { %v93_v37 = vadd.f32 %v632_v33, %v92_v36 }
  0x10   :  { %v807_v38 = vsel %vm94_vm1, %v632_v33, %v93_v37 }
  0x13   :  { %72 = vadd.xlane.f32.xlu2 %v71_v15  ;;  %45 = vadd.xlane.f32.xlu0 %v44_v16 }
  0x14   :  { %57 = vadd.xlane.f32.xlu1 %v56_v17 }
  0x1b   :  { %60 = vadd.xlane.f32.xlu2 %v59_v21  ;;  %84 = vadd.xlane.f32.xlu0 %v83_v22 }
  0x1c   :  { %48 = vadd.xlane.f32.xlu1 %v47_v23 }
  0x23   :  { %51 = vadd.xlane.f32.xlu2 %v50_v27  ;;  %75 = vadd.xlane.f32.xlu0 %v74_v28 }
  0x24   :  { %87 = vadd.xlane.f32.xlu1 %v86_v29 }
  0x2b   :  { %63 = vadd.xlane.f32.xlu0 %v62_v31 }
  0x76   :  { %v70_v39 = vpop.xlane.xlu2 %69  ;;  %v67_v40 = vpop.xlane.xlu0 %66 }
  0x77   :  { %v104_v41 = vmul.f32 %v807_v38, %v67_v40  ;;  %v43_v42 = vpop.xlane.xlu1 %42  ;;  %v105_v56 = vmul.f32 %v807_v38, %v70_v39 }
  0x78   :  { %v96_v43 = vmul.f32 %v807_v38, %v43_v42 }
  0x79   :  { %v811_v44 = vsub.f32 %v30_v1, %v104_v41  ;;  %v841_v63 = vsub.f32 %v704_v0, %v105_v56 }
  0x7a   :  { %v813_v45 = vsub.f32 %v22_v2, %v96_v43 }
  0x7b   :  { %v136_v46 = vmul.f32 %v811_v44, %v811_v44  ;;  %v137_v11 = vmul.f32 %v841_v63, %v841_v63 }
  0x7c   :  { %v128_v47 = vmul.f32 %v813_v45, %v813_v45 }
  0x7d   :  { %v168_v48 = vsel %vm40_vm0, %v136_v46, 0.0  ;;  %v171_v21 = vsel %vm40_vm0, %v137_v11, 0.0 }
  0x7e   :  { %v82_v49 = vpop.xlane.xlu2 %81  ;;  %v79_v50 = vpop.xlane.xlu0 %78  ;;  %169 = vadd.xlane.f32.xlu1 %v168_v48  ;;  %v144_v51 = vsel %vm40_vm0, %v128_v47, 0.0 }
  0x7f   :  { %v109_v52 = vmul.f32 %v807_v38, %v82_v49  ;;  %v108_v53 = vmul.f32 %v807_v38, %v79_v50  ;;  %145 = vadd.xlane.f32.xlu0 %v144_v51  ;;  %v55_v54 = vpop.xlane.xlu1 %54 }
  0x80   :  { %v100_v55 = vmul.f32 %v807_v38, %v55_v54 }
  0x81   :  { %v826_v57 = vsub.f32 %v719_v6, %v109_v52  ;;  %v829_v58 = vsub.f32 %v724_v7, %v108_v53 }
  0x82   :  { %v832_v59 = vsub.f32 %v729_v8, %v100_v55 }
  0x83   :  { %v140_v60 = vmul.f32 %v829_v58, %v829_v58  ;;  %v141_v61 = vmul.f32 %v826_v57, %v826_v57 }
  0x84   :  { %v132_v62 = vmul.f32 %v832_v59, %v832_v59 }
  0x85   :  { %v180_v1 = vsel %vm40_vm0, %v140_v60, 0.0  ;;  %v183_v2 = vsel %vm40_vm0, %v141_v61, 0.0 }
  0x86   :  { %v73_v3 = vpop.xlane.xlu2 %72  ;;  %181 = vadd.xlane.f32.xlu2 %v180_v1  ;;  %v46_v4 = vpop.xlane.xlu0 %45  ;;  %v156_v5 = vsel %vm40_vm0, %v132_v62, 0.0  ;;  %v457_v62 = vld [vmem:[%s1490_s3 + $0x18] sm:$0xff]  ;;  %v455_v1 = vld [vmem:[%s1490_s3 + $0x8] sm:$0xff] }
  0x87   :  { %v106_v6 = vmul.f32 %v807_v38, %v73_v3  ;;  %v97_v7 = vmul.f32 %v807_v38, %v46_v4  ;;  %184 = vadd.xlane.f32.xlu0 %v183_v2  ;;  %157 = vadd.xlane.f32.xlu1 %v156_v5  ;;  %v58_v8 = vpop.xlane.xlu1 %57  ;;  %v454_v3 = vld [vmem:[%s1490_s3] sm:$0xff] }
  0x88   :  { %v101_v9 = vmul.f32 %v807_v38, %v58_v8  ;;  %522 = vmatpush.msra.mxu0 %v457_v62  ;;  %616 = vmatpush.msra.mxu2 %v457_v62 }
  0x89   :  { %v850_v0 = vsub.f32 %v740_v12, %v106_v6  ;;  %v853_v10 = vsub.f32 %v745_v13, %v97_v7  ;;  %615 = vmatpush.msra.mxu1 %v457_v62  ;;  %617 = vmatpush.msra.mxu3 %v457_v62 }
  0x8a   :  { %v862_v17 = vsub.f32 %v750_v14, %v101_v9 }
  0x8b   :  { %v138_v15 = vmul.f32 %v850_v0, %v850_v0  ;;  %v129_v16 = vmul.f32 %v853_v10, %v853_v10 }
  0x8c   :  { %v133_v29 = vmul.f32 %v862_v17, %v862_v17 }
  0x8d   :  { %v174_v12 = vsel %vm40_vm0, %v138_v15, 0.0  ;;  %v147_v22 = vsel %vm40_vm0, %v129_v16, 0.0 }
  0x8e   :  { %v61_v13 = vpop.xlane.xlu2 %60  ;;  %172 = vadd.xlane.f32.xlu2 %v171_v21  ;;  %v85_v23 = vpop.xlane.xlu0 %84  ;;  %v159_v36 = vsel %vm40_vm0, %v133_v29, 0.0 }
  0x8f   :  { %v102_v27 = vmul.f32 %v807_v38, %v61_v13  ;;  %v110_v28 = vmul.f32 %v807_v38, %v85_v23  ;;  %175 = vadd.xlane.f32.xlu0 %v174_v12  ;;  %148 = vadd.xlane.f32.xlu1 %v147_v22  ;;  %v49_v14 = vpop.xlane.xlu1 %48 }
  0x90   :  { %v98_v31 = vmul.f32 %v807_v38, %v49_v14 }
  0x91   :  { %v873_v32 = vsub.f32 %v761_v18, %v102_v27  ;;  %v876_v33 = vsub.f32 %v766_v19, %v110_v28 }
  0x92   :  { %v884_v37 = vsub.f32 %v771_v20, %v98_v31 }
  0x93   :  { %v134_v34 = vmul.f32 %v873_v32, %v873_v32  ;;  %v142_v35 = vmul.f32 %v876_v33, %v876_v33 }
  0x94   :  { %v130_v43 = vmul.f32 %v884_v37, %v884_v37 }
  0x95   :  { %v162_v39 = vsel %vm40_vm0, %v134_v34, 0.0  ;;  %v186_v40 = vsel %vm40_vm0, %v142_v35, 0.0 }
  0x96   :  { %v52_v18 = vpop.xlane.xlu2 %51  ;;  %v76_v41 = vpop.xlane.xlu0 %75  ;;  %160 = vadd.xlane.f32.xlu2 %v159_v36  ;;  %v150_v51 = vsel %vm40_vm0, %v130_v43, 0.0 }
  0x97   :  { %v99_v19 = vmul.f32 %v807_v38, %v52_v18  ;;  %v107_v42 = vmul.f32 %v807_v38, %v76_v41  ;;  %163 = vadd.xlane.f32.xlu0 %v162_v39  ;;  %187 = vadd.xlane.f32.xlu1 %v186_v40  ;;  %v88_v46 = vpop.xlane.xlu1 %87 }
  0x98   :  { %v111_v20 = vmul.f32 %v807_v38, %v88_v46 }
  0x99   :  { %v894_v47 = vsub.f32 %v782_v24, %v99_v19  ;;  %v897_v48 = vsub.f32 %v787_v25, %v107_v42 }
  0x9a   :  { %v905_v52 = vsub.f32 %v792_v26, %v111_v20 }
  0x9b   :  { %v131_v49 = vmul.f32 %v894_v47, %v894_v47  ;;  %v139_v50 = vmul.f32 %v897_v48, %v897_v48 }
  0x9c   :  { %v143_v55 = vmul.f32 %v905_v52, %v905_v52 }
  0x9d   :  { %v153_v53 = vsel %vm40_vm0, %v131_v49, 0.0  ;;  %v177_v54 = vsel %vm40_vm0, %v139_v50, 0.0 }
  0x9e   :  { %v64_v24 = vpop.xlane.xlu0 %63  ;;  %151 = vadd.xlane.f32.xlu2 %v150_v51  ;;  %v189_v60 = vsel %vm40_vm0, %v143_v55, 0.0 }
  0x9f   :  { %v103_v25 = vmul.f32 %v807_v38, %v64_v24  ;;  %154 = vadd.xlane.f32.xlu0 %v153_v53  ;;  %178 = vadd.xlane.f32.xlu1 %v177_v54 }
  0xa1   :  { %v913_v56 = vsub.f32 %v803_v30, %v103_v25  ;;  %v456_v30 = vld [vmem:[%s1490_s3 + $0x10] sm:$0xff] }
  0xa2   :  { %523 = vmatpush.msra.mxu0 %v456_v30  ;;  %619 = vmatpush.msra.mxu2 %v456_v30 }
  0xa3   :  { %v135_v26 = vmul.f32 %v913_v56, %v913_v56  ;;  %618 = vmatpush.msra.mxu1 %v456_v30  ;;  %620 = vmatpush.msra.mxu3 %v456_v30 }
  0xa4   :  { %524 = vmatpush.msra.mxu0 %v455_v1  ;;  %622 = vmatpush.msra.mxu2 %v455_v1 }
  0xa5   :  { %v165_v61 = vsel %vm40_vm0, %v135_v26, 0.0  ;;  %621 = vmatpush.msra.mxu1 %v455_v1  ;;  %623 = vmatpush.msra.mxu3 %v455_v1 }
  0xa6   :  { %190 = vadd.xlane.f32.xlu2 %v189_v60  ;;  %525 = vmatpush.msra.mxu0 %v454_v3 }
  0xa7   :  { %166 = vadd.xlane.f32.xlu1 %v165_v61  ;;  %625 = vmatpush.msra.mxu2 %v454_v3 }
  0xa8   :  { %624 = vmatpush.msra.mxu1 %v454_v3  ;;  %626 = vmatpush.msra.mxu3 %v454_v3 }
  0xf1   :  { %v170_v2 = vpop.xlane.xlu1 %169 }
  0xf2   :  { %v146_v4 = vpop.xlane.xlu0 %145  ;;  %v200_v5 = vmul.f32 %v170_v2, %v807_v38 }
  0xf3   :  { %v192_v6 = vmul.f32 %v146_v4, %v807_v38 }
  0xf4   :  { %v216_v7 = vadd.f32 1e-06, %v200_v5 }
  0xf5   :  { %v208_v8 = vadd.f32 1e-06, %v192_v6 }
  0xf6   :  { %633 = vrsqrt.f32 %v216_v7  ;;  %vm310_vm5 = vweird.f32 %v216_v7 }
  0xf7   :  { %635 = vrsqrt.f32 %v208_v8  ;;  %vm230_vm2 = vweird.f32 %v208_v8 }
  0xf9   :  { %v182_v9 = vpop.xlane.xlu2 %181 }
  0xfa   :  { %v204_v11 = vmul.f32 %v182_v9, %v807_v38  ;;  %v185_v15 = vpop.xlane.xlu0 %184  ;;  %v158_v16 = vpop.xlane.xlu1 %157 }
  0xfb   :  { %v205_v21 = vmul.f32 %v185_v15, %v807_v38  ;;  %v196_v12 = vmul.f32 %v158_v16, %v807_v38 }
  0xfc   :  { %v936_v22 = vpop.eup %633  ;;  %v938_v13 = vadd.f32 1e-06, %v204_v11 }
  0xfd   :  { %v940_v23 = vpop.eup %635  ;;  %v305_v27 = vmul.f32 %v936_v22, %v216_v7  ;;  %v943_v28 = vadd.f32 1e-06, %v205_v21  ;;  %v945_v29 = vadd.f32 1e-06, %v196_v12  ;;  %vm311_vm4 = vweird.f32 %v936_v22 }
  0xfe   :  { %v225_v14 = vmul.f32 %v940_v23, %v208_v8  ;;  %637 = vrsqrt.f32 %v938_v13  ;;  %vm231_vm3 = vweird.f32 %v940_v23  ;;  %vm980_vm6 = vmor %vm310_vm5, %vm311_vm4  ;;  %vm350_vm8 = vweird.f32 %v938_v13 }
  0xff   :  { %v306_v31 = vmul.f32 %v936_v22, %v305_v27  ;;  %639 = vrsqrt.f32 %v943_v28  ;;  %vm990_vm7 = vmor %vm230_vm2, %vm231_vm3  ;;  %vm360_vm9 = vweird.f32 %v943_v28  ;;  %vm270_vm10 = vweird.f32 %v945_v29 }
 0x100   :  { %v226_v34 = vmul.f32 %v940_v23, %v225_v14  ;;  %641 = vrsqrt.f32 %v945_v29 }
 0x101   :  { %v307_v35 = vmul.f32 0.5, %v306_v31  ;;  %v173_v36 = vpop.xlane.xlu2 %172 }
 0x102   :  { %v227_v39 = vmul.f32 0.5, %v226_v34  ;;  %v201_v40 = vmul.f32 %v173_v36, %v807_v38  ;;  %v176_v18 = vpop.xlane.xlu0 %175  ;;  %v149_v41 = vpop.xlane.xlu1 %148  ;;  %v1022_v36 = vld [vmem:[%s1487_s1] ss:$0 sm:$0xff] }
 0x103   :  { %v308_v19 = vsub.f32 1.5, %v307_v35  ;;  %v202_v42 = vmul.f32 %v176_v18, %v807_v38  ;;  %v193_v53 = vmul.f32 %v149_v41, %v807_v38 }
 0x104   :  { %v955_v43 = vpop.eup %637  ;;  %v228_v46 = vsub.f32 1.5, %v227_v39  ;;  %v957_v20 = vadd.f32 1e-06, %v201_v40 }
 0x105   :  { %v959_v49 = vpop.eup %639  ;;  %v345_v50 = vmul.f32 %v955_v43, %v938_v13  ;;  %v963_v51 = vadd.f32 1e-06, %v202_v42  ;;  %v309_v55 = vmul.f32 %v936_v22, %v308_v19  ;;  %v985_v2 = vadd.f32 1e-06, %v193_v53 }
 0x106   :  { %v966_v54 = vpop.eup %641  ;;  %v355_v24 = vmul.f32 %v959_v49, %v943_v28  ;;  %643 = vrsqrt.f32 %v957_v20  ;;  %v229_v25 = vmul.f32 %v940_v23, %v228_v46  ;;  %vm361_vm11 = vweird.f32 %v959_v49 }
 0x107   :  { %v346_v26 = vmul.f32 %v955_v43, %v345_v50  ;;  %v265_v60 = vmul.f32 %v966_v54, %v945_v29  ;;  %645 = vrsqrt.f32 %v963_v51  ;;  %v313_v15 = vsel %vm980_vm6, %v936_v22, %v309_v55  ;;  %vm1054_vm1 = vmor %vm360_vm9, %vm361_vm11 }
 0x108   :  { %v356_v61 = vmul.f32 %v959_v49, %v355_v24  ;;  %v233_v11 = vsel %vm990_vm7, %v940_v23, %v229_v25  ;;  %647 = vrsqrt.f32 %v985_v2  ;;  %v392_v39 = vmul.f32 %v313_v15, %v811_v44  ;;  %v1038_v44 = vld [vmem:[%s1488_s2] ss:$0 sm:$0xff] }
 0x109   :  { %v347_v30 = vmul.f32 0.5, %v346_v26  ;;  %v266_v1 = vmul.f32 %v966_v54, %v265_v60  ;;  %v161_v3 = vpop.xlane.xlu2 %160  ;;  %v384_v35 = vmul.f32 %v233_v11, %v813_v45  ;;  %vm351_vm12 = vweird.f32 %v955_v43 }
 0x10a   :  { %v357_v5 = vmul.f32 0.5, %v356_v61  ;;  %v164_v6 = vpop.xlane.xlu0 %163  ;;  %v197_v7 = vmul.f32 %v161_v3, %v807_v38  ;;  %v188_v9 = vpop.xlane.xlu1 %187  ;;  %vm271_vm13 = vweird.f32 %v966_v54  ;;  %vm320_vm14 = vweird.f32 %v957_v20  ;;  %vm1072_vm4 = vmor %vm350_vm8, %vm351_vm12 }
 0x10b   :  { %v267_v8 = vmul.f32 0.5, %v266_v1  ;;  %v348_v21 = vsub.f32 1.5, %v347_v30  ;;  %v198_v12 = vmul.f32 %v164_v6, %v807_v38  ;;  %v206_v23 = vmul.f32 %v188_v9, %v807_v38  ;;  %vm1097_vm6 = vmor %vm270_vm10, %vm271_vm13 }
 0x10c   :  { %v1003_v16 = vpop.eup %643  ;;  %v1007_v27 = vadd.f32 1e-06, %v197_v7  ;;  %v358_v14 = vsub.f32 1.5, %v357_v5  ;;  %vm330_vm15 = vweird.f32 %v963_v51  ;;  %vm240_vm3 = vweird.f32 %v985_v2 }
 0x10d   :  { %v315_v22 = vmul.f32 %v1003_v16, %v957_v20  ;;  %v1013_v31 = vpop.eup %645  ;;  %v1015_v34 = vadd.f32 1e-06, %v198_v12  ;;  %v268_v40 = vsub.f32 1.5, %v267_v8  ;;  %v1030_v19 = vmul.f32 %v955_v43, %v348_v21 }
 0x10e   :  { %649 = vrsqrt.f32 %v1007_v27  ;;  %v325_v41 = vmul.f32 %v1013_v31, %v963_v51  ;;  %v1040_v45 = vpop.eup %647  ;;  %v1043_v42 = vmul.f32 %v959_v49, %v358_v14  ;;  %v1048_v53 = vadd.f32 1e-06, %v206_v23 }
 0x10f   :  { %v316_v18 = vmul.f32 %v1003_v16, %v315_v22  ;;  %651 = vrsqrt.f32 %v1015_v34  ;;  %vm321_vm2 = vweird.f32 %v1003_v16  ;;  %v235_v55 = vmul.f32 %v1040_v45, %v985_v2 }
 0x110   :  { %v326_v50 = vmul.f32 %v1013_v31, %v325_v41  ;;  %v403_v26 = vmul.f32 %v1022_v36, %v384_v35  ;;  %v411_v60 = vmul.f32 %v1022_v36, %v392_v39  ;;  %v269_v30 = vmul.f32 %v966_v54, %v268_v40  ;;  %vm1139_vm10 = vmor %vm320_vm14, %vm321_vm2 }
 0x111   :  { %v317_v46 = vmul.f32 0.5, %v316_v18  ;;  %v152_v24 = vpop.xlane.xlu2 %151  ;;  %653 = vrsqrt.f32 %v1048_v53  ;;  %v236_v5 = vmul.f32 %v1040_v45, %v235_v55  ;;  %v353_v11 = vsel %vm1072_vm4, %v955_v43, %v1030_v19 }
 0x112   :  { %v155_v61 = vpop.xlane.xlu0 %154  ;;  %v179_v62 = vpop.xlane.xlu1 %178  ;;  %v327_v1 = vmul.f32 0.5, %v326_v50  ;;  %v422_v6 = vadd.f32 %v1038_v44, %v403_v26  ;;  %v430_v7 = vadd.f32 %v1038_v44, %v411_v60  ;;  %v363_v13 = vsel %vm1054_vm1, %v959_v49, %v1043_v42 }
 0x113   :  { %v318_v28 = vsub.f32 1.5, %v317_v46  ;;  %v195_v9 = vmul.f32 %v155_v61, %v807_v38  ;;  %vm331_vm5 = vweird.f32 %v1013_v31  ;;  %v237_v43 = vmul.f32 0.5, %v236_v5 }
 0x114   :  { %v1066_v3 = vpop.eup %649  ;;  %438 = vst.msk [vmem:[%s1491_s5] sm:$0xff] %vm40_vm0, %v422_v6  ;;  %599 = vmatmul.msk.f32.vlgmr.msra.gmra.mxu0 %vm40_vm0, %v422_v6  ;;  %607 = vmatmul.msk.f32.vlgmr.msra.gmra.mxu2 %vm40_vm0, %v430_v7  ;;  %v194_v14 = vmul.f32 %v152_v24, %v807_v38  ;;  %v203_v29 = vmul.f32 %v179_v62, %v807_v38  ;;  %v328_v35 = vsub.f32 1.5, %v327_v1  ;;  %vm241_vm7 = vweird.f32 %v1040_v45  ;;  %vm1160_vm13 = vmor %vm330_vm15, %vm331_vm5 }
 0x115   :  { %v275_v15 = vmul.f32 %v1066_v3, %v1007_v27  ;;  %v1091_v8 = vpop.eup %651  ;;  %v1107_v12 = vadd.f32 1e-06, %v195_v9  ;;  %v273_v22 = vsel %vm1097_vm6, %v966_v54, %v269_v30  ;;  %v1115_v23 = vmul.f32 %v1003_v16, %v318_v28  ;;  %446 = vst.msk [vmem:[%s1491_s5 + $0x40] sm:$0xff] %vm40_vm0, %v430_v7  ;;  %vm1171_vm2 = vmor %vm240_vm3, %vm241_vm7 }
 0x116   :  { %v285_v39 = vmul.f32 %v1091_v8, %v1015_v34  ;;  %v238_v40 = vsub.f32 1.5, %v237_v43  ;;  %vm280_vm8 = vweird.f32 %v1007_v27  ;;  %vm370_vm9 = vweird.f32 %v1048_v53 }
 0x117   :  { %v276_v18 = vmul.f32 %v1066_v3, %v275_v15  ;;  %655 = vrsqrt.f32 %v1107_v12  ;;  %v1126_v54 = vpop.eup %653  ;;  %v1131_v19 = vadd.f32 1e-06, %v194_v14  ;;  %v1133_v46 = vadd.f32 1e-06, %v203_v29 }
 0x118   :  { %v286_v41 = vmul.f32 %v1091_v8, %v285_v39  ;;  %v239_v24 = vmul.f32 %v1040_v45, %v238_v40  ;;  %vm281_vm11 = vweird.f32 %v1066_v3  ;;  %v365_v26 = vmul.f32 %v1126_v54, %v1048_v53 }
 0x119   :  { %v277_v55 = vmul.f32 0.5, %v276_v18  ;;  %v191_v60 = vpop.xlane.xlu2 %190  ;;  %v323_v61 = vsel %vm1139_vm10, %v1003_v16, %v1115_v23  ;;  %v1152_v20 = vmul.f32 %v1013_v31, %v328_v35  ;;  %vm290_vm12 = vweird.f32 %v1015_v34  ;;  %vm1214_vm5 = vmor %vm280_vm8, %vm281_vm11 }
 0x11a   :  { %v287_v62 = vmul.f32 0.5, %v286_v41  ;;  %657 = vrsqrt.f32 %v1131_v19  ;;  %v167_v30 = vpop.xlane.xlu1 %166  ;;  %vm291_vm14 = vweird.f32 %v1091_v8  ;;  %v366_v1 = vmul.f32 %v1126_v54, %v365_v26 }
 0x11b   :  { %v278_v16 = vsub.f32 1.5, %v277_v55  ;;  %659 = vrsqrt.f32 %v1133_v46  ;;  %vm260_vm15 = vweird.f32 %v1107_v12  ;;  %v388_v51 = vmul.f32 %v273_v22, %v832_v59 }
 0x11c   :  { %v396_v5 = vmul.f32 %v353_v11, %v829_v58  ;;  %v207_v6 = vmul.f32 %v191_v60, %v807_v38  ;;  %v243_v9 = vsel %vm1171_vm2, %v1040_v45, %v239_v24  ;;  %v288_v15 = vsub.f32 1.5, %v287_v62 }
 0x11d   :  { %v1179_v7 = vpop.eup %655  ;;  %v367_v2 = vmul.f32 0.5, %v366_v1  ;;  %v199_v21 = vmul.f32 %v167_v30, %v807_v38  ;;  %v333_v43 = vsel %vm1160_vm13, %v1013_v31, %v1152_v20  ;;  %v279_v59 = vmul.f32 %v1066_v3, %v278_v16 }
 0x11e   :  { %v255_v58 = vmul.f32 %v1179_v7, %v1107_v12  ;;  %v407_v11 = vmul.f32 %v1022_v36, %v388_v51  ;;  %vm371_vm3 = vweird.f32 %v1126_v54  ;;  %v415_v45 = vmul.f32 %v1022_v36, %v396_v5 }
 0x11f   :  { %v368_v14 = vsub.f32 1.5, %v367_v2  ;;  %v1195_v29 = vadd.f32 1e-06, %v207_v6  ;;  %vm340_vm4 = vweird.f32 %v1133_v46  ;;  %v1202_v23 = vadd.f32 1e-06, %v199_v21  ;;  %vm1238_vm7 = vmor %vm370_vm9, %vm371_vm3 }
 0x120   :  { %v1197_v38 = vpop.eup %657  ;;  %v256_v22 = vmul.f32 %v1179_v7, %v255_v58  ;;  %v426_v31 = vadd.f32 %v1038_v44, %v407_v11  ;;  %v385_v35 = vmul.f32 %v243_v9, %v853_v10  ;;  %v1208_v40 = vmul.f32 %v1091_v8, %v288_v15  ;;  %vm1260_vm9 = vmor %vm290_vm12, %vm291_vm14 }
 0x121   :  { %v1205_v39 = vpop.eup %659  ;;  %v369_v41 = vmul.f32 %v1126_v54, %v368_v14  ;;  %v245_v50 = vmul.f32 %v1197_v38, %v1131_v19  ;;  %vm250_vm6 = vweird.f32 %v1131_v19  ;;  %v434_v10 = vadd.f32 %v1038_v44, %v415_v45 }
 0x122   :  { %v283_v24 = vsel %vm1214_vm5, %v1066_v3, %v279_v59  ;;  %v257_v55 = vmul.f32 0.5, %v256_v22  ;;  %v335_v27 = vmul.f32 %v1205_v39, %v1133_v46  ;;  %442 = vst.msk [vmem:[%s1491_s5 + $0x20] sm:$0xff] %vm40_vm0, %v426_v31  ;;  %603 = vmatmul.msk.f32.vlgmr.msra.gmra.mxu1 %vm40_vm0, %v426_v31  ;;  %661 = vrsqrt.f32 %v1195_v29 }
 0x123   :  { %vm261_vm8 = vweird.f32 %v1179_v7  ;;  %v246_v3 = vmul.f32 %v1197_v38, %v245_v50  ;;  %vm251_vm10 = vweird.f32 %v1197_v38  ;;  %450 = vst.msk [vmem:[%s1491_s5 + $0x60] sm:$0xff] %vm40_vm0, %v434_v10  ;;  %611 = vmatmul.msk.f32.vlgmr.msra.gmra.mxu3 %vm40_vm0, %v434_v10  ;;  %663 = vrsqrt.f32 %v1202_v23 }
 0x124   :  { %v373_v53 = vsel %vm1238_vm7, %v1126_v54, %v369_v41  ;;  %v258_v60 = vsub.f32 1.5, %v257_v55  ;;  %v336_v20 = vmul.f32 %v1205_v39, %v335_v27  ;;  %v404_v62 = vmul.f32 %v1022_v36, %v385_v35  ;;  %vm1279_vm11 = vmor %vm260_vm15, %vm261_vm8 }
 0x125   :  { %v247_v28 = vmul.f32 0.5, %v246_v3  ;;  %v393_v16 = vmul.f32 %v323_v61, %v841_v63  ;;  %v397_v54 = vmul.f32 %v363_v13, %v826_v57  ;;  %v389_v1 = vmul.f32 %v283_v24, %v862_v17  ;;  %vm1311_vm12 = vmor %vm250_vm6, %vm251_vm10 }
 0x126   :  { %v259_v4 = vmul.f32 %v1179_v7, %v258_v60  ;;  %v337_v51 = vmul.f32 0.5, %v336_v20  ;;  %v423_v34 = vadd.f32 %v1038_v44, %v404_v62  ;;  %v394_v5 = vmul.f32 %v333_v43, %v850_v0 }
 0x127   :  { %v248_v25 = vsub.f32 1.5, %v247_v28  ;;  %v412_v57 = vmul.f32 %v1022_v36, %v393_v16  ;;  %v416_v17 = vmul.f32 %v1022_v36, %v397_v54  ;;  %v408_v49 = vmul.f32 %v1022_v36, %v389_v1 }
 0x128   :  { %v1286_v42 = vpop.eup %661  ;;  %v293_v0 = vsel %vm1260_vm9, %v1091_v8, %v1208_v40  ;;  %v338_v13 = vsub.f32 1.5, %v337_v51  ;;  %vm341_vm1 = vweird.f32 %v1205_v39  ;;  %439 = vst.msk [vmem:[%s1491_s5 + $0x8] sm:$0xff] %vm40_vm0, %v423_v34  ;;  %600 = vmatmul.msk.f32.gmra.mxu0 %vm40_vm0, %v423_v34  ;;  %v413_v12 = vmul.f32 %v1022_v36, %v394_v5 }
 0x129   :  { %v664_v61 = vpop.eup %663  ;;  %v249_v6 = vmul.f32 %v1197_v38, %v248_v25  ;;  %v375_v9 = vmul.f32 %v1286_v42, %v1195_v29  ;;  %v431_v8 = vadd.f32 %v1038_v44, %v412_v57  ;;  %v398_v15 = vmul.f32 %v373_v53, %v876_v33  ;;  %vm1325_vm13 = vmor %vm340_vm4, %vm341_vm1 }
 0x12a   :  { %v263_v2 = vsel %vm1279_vm11, %v1179_v7, %v259_v4  ;;  %v339_v43 = vmul.f32 %v1205_v39, %v338_v13  ;;  %v295_v59 = vmul.f32 %v664_v61, %v1202_v23  ;;  %v435_v58 = vadd.f32 %v1038_v44, %v416_v17 }
 0x12b   :  { %v253_v33 = vsel %vm1311_vm12, %v1197_v38, %v249_v6  ;;  %v376_v7 = vmul.f32 %v1286_v42, %v375_v9  ;;  %447 = vst.msk [vmem:[%s1491_s5 + $0x48] sm:$0xff] %vm40_vm0, %v431_v8  ;;  %608 = vmatmul.msk.f32.gmra.mxu2 %vm40_vm0, %v431_v8  ;;  %v427_v11 = vadd.f32 %v1038_v44, %v408_v49  ;;  %vm300_vm14 = vweird.f32 %v1202_v23 }
 0x12c   :  { %v343_v14 = vsel %vm1325_vm13, %v1205_v39, %v339_v43  ;;  %v296_v46 = vmul.f32 %v664_v61, %v295_v59  ;;  %451 = vst.msk [vmem:[%s1491_s5 + $0x68] sm:$0xff] %vm40_vm0, %v435_v58  ;;  %612 = vmatmul.msk.f32.gmra.mxu3 %vm40_vm0, %v435_v58  ;;  %v432_v45 = vadd.f32 %v1038_v44, %v413_v12  ;;  %vm381_vm2 = vweird.f32 %v1286_v42 }
 0x12d   :  { %v377_v38 = vmul.f32 0.5, %v376_v7  ;;  %443 = vst.msk [vmem:[%s1491_s5 + $0x28] sm:$0xff] %vm40_vm0, %v427_v11  ;;  %604 = vmatmul.msk.f32.gmra.mxu1 %vm40_vm0, %v427_v11  ;;  %v417_v22 = vmul.f32 %v1022_v36, %v398_v15  ;;  %v386_v31 = vmul.f32 %v253_v33, %v884_v37  ;;  %v390_v35 = vmul.f32 %v293_v0, %v873_v32 }
 0x12e   :  { %v297_v39 = vmul.f32 0.5, %v296_v46  ;;  %448 = vst.msk [vmem:[%s1491_s5 + $0x50] sm:$0xff] %vm40_vm0, %v432_v45  ;;  %v395_v40 = vmul.f32 %v343_v14, %v897_v48  ;;  %v387_v18 = vmul.f32 %v263_v2, %v894_v47  ;;  %vm301_vm15 = vweird.f32 %v664_v61 }
 0x12f   :  { %v378_v41 = vsub.f32 1.5, %v377_v38  ;;  %v436_v50 = vadd.f32 %v1038_v44, %v417_v22  ;;  %v405_v10 = vmul.f32 %v1022_v36, %v386_v31  ;;  %v409_v37 = vmul.f32 %v1022_v36, %v390_v35  ;;  %vm302_vm5 = vmor %vm300_vm14, %vm301_vm15 }
 0x130   :  { %v298_v32 = vsub.f32 1.5, %v297_v39  ;;  %v414_v24 = vmul.f32 %v1022_v36, %v395_v40  ;;  %v406_v55 = vmul.f32 %v1022_v36, %v387_v18  ;;  %vm380_vm3 = vweird.f32 %v1195_v29 }
 0x131   :  { %v379_v27 = vmul.f32 %v1286_v42, %v378_v41  ;;  %452 = vst.msk [vmem:[%s1491_s5 + $0x70] sm:$0xff] %vm40_vm0, %v436_v50  ;;  %v424_v47 = vadd.f32 %v1038_v44, %v405_v10  ;;  %v428_v48 = vadd.f32 %v1038_v44, %v409_v37  ;;  %vm382_vm4 = vmor %vm380_vm3, %vm381_vm2 }
 0x132   :  { %v299_v26 = vmul.f32 %v664_v61, %v298_v32  ;;  %v433_v3 = vadd.f32 %v1038_v44, %v414_v24  ;;  %v425_v53 = vadd.f32 %v1038_v44, %v406_v55 }
 0x133   :  { %v383_v60 = vsel %vm382_vm4, %v1286_v42, %v379_v27  ;;  %609 = vmatmul.msk.f32.gmra.mxu2 %vm40_vm0, %v432_v45  ;;  %440 = vst.msk [vmem:[%s1491_s5 + $0x10] sm:$0xff] %vm40_vm0, %v424_v47  ;;  %601 = vmatmul.msk.f32.gmra.mxu0 %vm40_vm0, %v424_v47 }
 0x134   :  { %v303_v29 = vsel %vm302_vm5, %v664_v61, %v299_v26  ;;  %613 = vmatmul.msk.f32.gmra.mxu3 %vm40_vm0, %v436_v50  ;;  %444 = vst.msk [vmem:[%s1491_s5 + $0x30] sm:$0xff] %vm40_vm0, %v428_v48  ;;  %v399_v23 = vmul.f32 %v383_v60, %v905_v52 }
 0x135   :  { %605 = vmatmul.msk.f32.gmra.mxu1 %vm40_vm0, %v428_v48  ;;  %449 = vst.msk [vmem:[%s1491_s5 + $0x58] sm:$0xff] %vm40_vm0, %v433_v3  ;;  %v391_v20 = vmul.f32 %v303_v29, %v913_v56  ;;  %v630_v56 = vld [vmem:[%s1489_s4] ss:$0 sm:$0xff] }
 0x136   :  { %441 = vst.msk [vmem:[%s1491_s5 + $0x18] sm:$0xff] %vm40_vm0, %v425_v53  ;;  %v418_v62 = vmul.f32 %v1022_v36, %v399_v23 }
 0x137   :  { %v410_v30 = vmul.f32 %v1022_v36, %v391_v20 }
 0x138   :  { %v437_v52 = vadd.f32 %v1038_v44, %v418_v62 }
 0x139   :  { %v429_v28 = vadd.f32 %v1038_v44, %v410_v30 }
 0x13a   :  { %453 = vst.msk [vmem:[%s1491_s5 + $0x78] sm:$0xff] %vm40_vm0, %v437_v52 }
 0x13b   :  { %610 = vmatmul.msk.f32.gmra.mxu2 %vm40_vm0, %v433_v3  ;;  %602 = vmatmul.msk.f32.gmra.mxu0 %vm40_vm0, %v425_v53  ;;  %445 = vst.msk [vmem:[%s1491_s5 + $0x38] sm:$0xff] %vm40_vm0, %v429_v28 }
 0x13c   :  { %614 = vmatmul.msk.f32.gmra.mxu3 %vm40_vm0, %v437_v52 }
 0x13d   :  { %606 = vmatmul.msk.f32.gmra.mxu1 %vm40_vm0, %v429_v28 }
 0x191   :  { %v527_v36 = vpop.f32.mrf.mxu0 }
 0x192   :  { %v528_v44 = vadd.f32 %v630_v56, %v527_v36 }
 0x194   :  { %575 = vst.msk [vmem:[%s1492_s6] sm:$0xff] %vm40_vm0, %v528_v44 }
 0x197   :  { %v551_v16 = vpop.f32.mrf.mxu2 }
 0x198   :  { %v552_v54 = vadd.f32 %v630_v56, %v551_v16 }
 0x19a   :  { %583 = vst.msk [vmem:[%s1492_s6 + $0x40] sm:$0xff] %vm40_vm0, %v552_v54 }
 0x19f   :  { %v539_v1 = vpop.f32.mrf.mxu1 }
 0x1a0   :  { %v540_v4 = vadd.f32 %v630_v56, %v539_v1 }
 0x1a2   :  { %579 = vst.msk [vmem:[%s1492_s6 + $0x20] sm:$0xff] %vm40_vm0, %v540_v4 }
 0x1a5   :  { %v530_v51 = vpop.f32.mrf.mxu0 }
 0x1a6   :  { %v563_v34 = vpop.f32.mrf.mxu3  ;;  %v531_v5 = vadd.f32 %v630_v56, %v530_v51 }
 0x1a7   :  { %v564_v63 = vadd.f32 %v630_v56, %v563_v34 }
 0x1a8   :  { %576 = vst.msk [vmem:[%s1492_s6 + $0x8] sm:$0xff] %vm40_vm0, %v531_v5 }
 0x1a9   :  { %587 = vst.msk [vmem:[%s1492_s6 + $0x60] sm:$0xff] %vm40_vm0, %v564_v63 }
 0x1aa   :  { %v542_v25 = vpop.f32.mrf.mxu1 }
 0x1ab   :  { %v543_v57 = vadd.f32 %v630_v56, %v542_v25 }
 0x1ad   :  { %580 = vst.msk [vmem:[%s1492_s6 + $0x28] sm:$0xff] %vm40_vm0, %v543_v57 }
 0x1ae   :  { %v554_v17 = vpop.f32.mrf.mxu2 }
 0x1af   :  { %v555_v49 = vadd.f32 %v630_v56, %v554_v17  ;;  %v566_v42 = vpop.f32.mrf.mxu3 }
 0x1b0   :  { %v567_v0 = vadd.f32 %v630_v56, %v566_v42  ;;  %v533_v13 = vpop.f32.mrf.mxu0 }
 0x1b1   :  { %584 = vst.msk [vmem:[%s1492_s6 + $0x48] sm:$0xff] %vm40_vm0, %v555_v49  ;;  %v534_v12 = vadd.f32 %v630_v56, %v533_v13 }
 0x1b2   :  { %588 = vst.msk [vmem:[%s1492_s6 + $0x68] sm:$0xff] %vm40_vm0, %v567_v0  ;;  %v545_v61 = vpop.f32.mrf.mxu1 }
 0x1b3   :  { %577 = vst.msk [vmem:[%s1492_s6 + $0x10] sm:$0xff] %vm40_vm0, %v534_v12  ;;  %v546_v6 = vadd.f32 %v630_v56, %v545_v61 }
 0x1b5   :  { %581 = vst.msk [vmem:[%s1492_s6 + $0x30] sm:$0xff] %vm40_vm0, %v546_v6 }
 0x1b6   :  { %v557_v9 = vpop.f32.mrf.mxu2 }
 0x1b7   :  { %v558_v8 = vadd.f32 %v630_v56, %v557_v9  ;;  %v569_v15 = vpop.f32.mrf.mxu3 }
 0x1b8   :  { %v570_v2 = vadd.f32 %v630_v56, %v569_v15  ;;  %v536_v21 = vpop.f32.mrf.mxu0 }
 0x1b9   :  { %585 = vst.msk [vmem:[%s1492_s6 + $0x50] sm:$0xff] %vm40_vm0, %v558_v8  ;;  %v537_v43 = vadd.f32 %v630_v56, %v536_v21 }
 0x1ba   :  { %589 = vst.msk [vmem:[%s1492_s6 + $0x70] sm:$0xff] %vm40_vm0, %v570_v2  ;;  %v548_v59 = vpop.f32.mrf.mxu1 }
 0x1bb   :  { %578 = vst.msk [vmem:[%s1492_s6 + $0x18] sm:$0xff] %vm40_vm0, %v537_v43  ;;  %v549_v58 = vadd.f32 %v630_v56, %v548_v59 }
 0x1bd   :  { %582 = vst.msk [vmem:[%s1492_s6 + $0x38] sm:$0xff] %vm40_vm0, %v549_v58 }
 0x1be   :  { %v560_v33 = vpop.f32.mrf.mxu2 }
 0x1bf   :  { %v561_v19 = vadd.f32 %v630_v56, %v560_v33  ;;  %v572_v7 = vpop.f32.mrf.mxu3 }
 0x1c0   :  { %v573_v11 = vadd.f32 %v630_v56, %v572_v7 }
 0x1c1   :  { %586 = vst.msk [vmem:[%s1492_s6 + $0x58] sm:$0xff] %vm40_vm0, %v561_v19 }
 0x1c2   :  { %590 = vst.msk [vmem:[%s1492_s6 + $0x78] sm:$0xff] %vm40_vm0, %v573_v11 }

</bundles_post_ra>
